<compile_context>
chip_gen: v6e
topology: v6e:2x2x1
jax: 0.10.0
libtpu: 0.0.40
codegen_flags: <defaults>
</compile_context>

<pallas_src>
import functools

import jax
import jax.numpy as jnp
from jax import lax
from jax.experimental import pallas as pl
from jax.experimental.pallas import tpu as pltpu

_HIDDEN = 256
_LANE = 128
_SUBLANE = 8


def _round_up(x, m):
    return ((x + m - 1) // m) * m


def _softplus(x, threshold):
    # PyTorch Softplus(beta=1, threshold=t): x if x > t else log(1 + exp(x))
    return jnp.where(x > threshold, x, jnp.log1p(jnp.exp(jnp.minimum(x, threshold))))


def _mdn_kernel(x_ref, w1_ref, b1_ref, w2_ref, b2_ref, out_ref,
                *, G, GO, inv_temperature):
    # Fused first layer for all three heads: (TB, D) @ (D, 3H) -> (TB, 3H)
    h = jnp.dot(x_ref[...], w1_ref[...],
                preferred_element_type=jnp.float32) + b1_ref[...]
    h = jnp.maximum(h, 0.0)

    # Fused block-diagonal second layer: (TB, 3H) @ (3H, Npad) -> (TB, Npad)
    z = jnp.dot(h.astype(w2_ref.dtype), w2_ref[...],
                preferred_element_type=jnp.float32) + b2_ref[...]

    col = lax.broadcasted_iota(jnp.int32, z.shape, 1)
    pi_mask = col < G

    # --- pi head: temperature-scaled softmax over the first G lanes ---
    logits = jnp.where(pi_mask, z * inv_temperature, -jnp.inf)
    m = jnp.max(logits, axis=1, keepdims=True)
    e = jnp.exp(logits - m)                       # 0 outside the pi lanes
    denom = jnp.sum(e, axis=1, keepdims=True)     # >= 1 (max term contributes 1)
    pi_val = e * pl.reciprocal(denom, approx=True)

    # --- sigma / mu heads: softplus with per-column threshold (20 / 5) ---
    thresh = jnp.where(col < G + GO, jnp.float32(20.0), jnp.float32(5.0))
    sp = jnp.where(z > thresh, z, jnp.log1p(jnp.exp(jnp.minimum(z, thresh))))

    valid = col < (G + 2 * GO)
    out_ref[...] = jnp.where(pi_mask, pi_val, jnp.where(valid, sp, 0.0))


def pack_mdn_params(params, num_gaussians, out_features, hidden=_HIDDEN):
    """Pack per-head weights into a fused (D, 3H) first layer and a
    block-diagonal, lane-padded (3H, Npad) second layer."""
    (w1p, b1p, w2p, b2p,
     w1s, b1s, w2s, b2s,
     w1m, b1m, w2m, b2m) = params
    G, O, H = num_gaussians, out_features, hidden
    GO = G * O
    n_out = G + 2 * GO
    n_pad = _round_up(n_out, _LANE)

    w1cat = jnp.concatenate([w1p, w1s, w1m], axis=1)    # (D, 3H)
    b1cat = jnp.concatenate([b1p, b1s, b1m], axis=1)    # (1, 3H)

    w2cat = jnp.zeros((3 * H, n_pad), jnp.float32)
    w2cat = w2cat.at[0:H, 0:G].set(w2p)
    w2cat = w2cat.at[H:2 * H, G:G + GO].set(w2s)
    w2cat = w2cat.at[2 * H:3 * H, G + GO:n_out].set(w2m)

    b2cat = jnp.zeros((1, n_pad), jnp.float32)
    b2cat = b2cat.at[:, 0:G].set(b2p)
    b2cat = b2cat.at[:, G:G + GO].set(b2s)
    b2cat = b2cat.at[:, G + GO:n_out].set(b2m)

    return w1cat, b1cat, w2cat, b2cat, n_pad


def _pick_batch_tile(B, D, n_pad, mm_itemsize, requested):
    """Largest batch tile (multiple of 8) whose double-buffered streamed tiles
    fit a conservative VMEM budget; weights are resident and small."""
    budget = 12 << 20  # bytes for streamed x/out tiles (x2 for double buffering)
    per_row = 2 * (D * mm_itemsize + n_pad * 4)
    max_tb = max(_SUBLANE, (budget // per_row) // _SUBLANE * _SUBLANE)
    tb = min(_round_up(requested, _SUBLANE), max_tb)
    if B < tb:
        tb = _round_up(B, _SUBLANE)
    return tb


def mdn_forward(x, params, num_gaussians, out_features, temperature=1.0,
                hidden=_HIDDEN, batch_tile=1024, use_bf16=False):
    """Pallas MDN forward.  x: (B, D) f32.  Returns (pi, sigma, mu)."""
    B, D = x.shape
    G, O = num_gaussians, out_features
    GO = G * O
    H3 = 3 * hidden

    w1cat, b1cat, w2cat, b2cat, n_pad = pack_mdn_params(
        params, num_gaussians, out_features, hidden)

    mm_dtype = jnp.bfloat16 if use_bf16 else jnp.float32
    itemsize = jnp.dtype(mm_dtype).itemsize

    # Batch tiling: TB rows per grid step, streamed/pipelined over the grid.
    TB = _pick_batch_tile(B, D, n_pad, itemsize, batch_tile)
    B_pad = _round_up(B, TB)
    x_p = x if B_pad == B else jnp.pad(x, ((0, B_pad - B), (0, 0)))

    x_p = x_p.astype(mm_dtype)
    w1cat = w1cat.astype(mm_dtype)
    w2cat = w2cat.astype(mm_dtype)

    kernel = functools.partial(
        _mdn_kernel, G=G, GO=GO, inv_temperature=float(1.0 / temperature))

    n_blocks = B_pad // TB
    flops = 2 * B_pad * (D * H3 + H3 * n_pad)
    transcendentals = 2 * B_pad * n_pad
    bytes_accessed = (B_pad * D * itemsize + D * H3 * itemsize
                      + H3 * n_pad * itemsize + 4 * (H3 + n_pad)
                      + B_pad * n_pad * 4)

    out = pl.pallas_call(
        kernel,
        out_shape=jax.ShapeDtypeStruct((B_pad, n_pad), jnp.float32),
        grid=(n_blocks,),
        in_specs=[
            pl.BlockSpec((TB, D), lambda i: (i, 0)),     # x tile streams
            pl.BlockSpec((D, H3), lambda i: (0, 0)),     # weights VMEM-resident
            pl.BlockSpec((1, H3), lambda i: (0, 0)),
            pl.BlockSpec((H3, n_pad), lambda i: (0, 0)),
            pl.BlockSpec((1, n_pad), lambda i: (0, 0)),
        ],
        out_specs=pl.BlockSpec((TB, n_pad), lambda i: (i, 0)),
        compiler_params=pltpu.CompilerParams(
            dimension_semantics=("parallel",),
            vmem_limit_bytes=64 << 20,
        ),
        cost_estimate=pl.CostEstimate(
            flops=int(flops), transcendentals=int(transcendentals),
            bytes_accessed=int(bytes_accessed)),
    )(x_p, w1cat, b1cat, w2cat, b2cat)

    # Split the lane-dense slab (pure XLA slices / layout glue).
    pi = out[:B, :G]
    sigma = out[:B, G:G + GO].reshape(B, G, O)
    mu = out[:B, G + GO:G + 2 * GO].reshape(B, G, O)
    return pi, sigma, mu


def init_mdn_params(key, in_features, out_features, num_gaussians, hidden=_HIDDEN):
    """Deterministic init mimicking PyTorch Linear's U(-1/sqrt(fan_in), 1/sqrt(fan_in)).
    Weights stored as (in, out) so kernels compute x @ W + b directly."""
    G, O = num_gaussians, out_features

    def linear(k, fan_in, fan_out):
        kw, kb = jax.random.split(k)
        bound = 1.0 / jnp.sqrt(fan_in)
        w = jax.random.uniform(kw, (fan_in, fan_out), jnp.float32, -bound, bound)
        b = jax.random.uniform(kb, (1, fan_out), jnp.float32, -bound, bound)
        return w, b

    keys = jax.random.split(key, 6)
    w1p, b1p = linear(keys[0], in_features, hidden)
    w2p, b2p = linear(keys[1], hidden, G)
    w1s, b1s = linear(keys[2], in_features, hidden)
    w2s, b2s = linear(keys[3], hidden, G * O)
    w1m, b1m = linear(keys[4], in_features, hidden)
    w2m, b2m = linear(keys[5], hidden, G * O)
    return (w1p, b1p, w2p, b2p,
            w1s, b1s, w2s, b2s,
            w1m, b1m, w2m, b2m)


def mdn_reference(x, params, num_gaussians, out_features, temperature=1.0):
    """Pure-JAX reference matching the PyTorch forward semantics."""
    (w1p, b1p, w2p, b2p,
     w1s, b1s, w2s, b2s,
     w1m, b1m, w2m, b2m) = params
    B = x.shape[0]

    def head(w1, b1, w2, b2):
        h = jnp.maximum(x @ w1 + b1, 0.0)
        return h @ w2 + b2

    pi = jax.nn.softmax(head(w1p, b1p, w2p, b2p) / temperature, axis=1)
    sigma = _softplus(head(w1s, b1s, w2s, b2s), 20.0).reshape(
        B, num_gaussians, out_features)
    mu = _softplus(head(w1m, b1m, w2m, b2m), 5.0).reshape(
        B, num_gaussians, out_features)
    return pi, sigma, mu


if __name__ == "__main__":
    # Small, forward-consistent shapes: B=8, in_features=32, O=4, G=8.
    B, in_features, out_features, num_gaussians = 8, 32, 4, 8
    temperature = 1.0

    key = jax.random.PRNGKey(0)
    kx, kp = jax.random.split(key)
    x = jax.random.normal(kx, (B, in_features), jnp.float32)
    params = init_mdn_params(kp, in_features, out_features, num_gaussians)

    # jit the wrapper so param packing / padding / output slicing fuse into one
    # compiled graph around the pallas_call (and are cached across calls).
    fwd = jax.jit(
        functools.partial(mdn_forward,
                          num_gaussians=num_gaussians,
                          out_features=out_features,
                          temperature=temperature))
    fwd_bf16 = jax.jit(
        functools.partial(mdn_forward,
                          num_gaussians=num_gaussians,
                          out_features=out_features,
                          temperature=temperature,
                          use_bf16=True))

    pi, sigma, mu = fwd(x, params)
    jax.block_until_ready((pi, sigma, mu))

    pi_r, sigma_r, mu_r = mdn_reference(x, params, num_gaussians, out_features, temperature)
    assert pi.shape == (B, num_gaussians)
    assert sigma.shape == (B, num_gaussians, out_features)
    assert mu.shape == (B, num_gaussians, out_features)
    # pi uses the approximate EUP reciprocal -> slightly looser tolerance.
    assert jnp.allclose(pi, pi_r, atol=1e-3, rtol=1e-3)
    assert jnp.allclose(sigma, sigma_r, atol=1e-5, rtol=1e-5)
    assert jnp.allclose(mu, mu_r, atol=1e-5, rtol=1e-5)

    # Optional bf16 MXU path (f32 accumulation): looser tolerance vs f32 reference.
    pi_b, sigma_b, mu_b = fwd_bf16(x, params)
    jax.block_until_ready((pi_b, sigma_b, mu_b))
    assert jnp.allclose(pi_b, pi_r, atol=5e-2, rtol=5e-2)
    assert jnp.allclose(sigma_b, sigma_r, atol=5e-2, rtol=5e-2)
    assert jnp.allclose(mu_b, mu_r, atol=5e-2, rtol=5e-2)

    print("KERNEL_OK")
</pallas_src>

<mosaic_0001>
module attributes {stable_mosaic.version = 11 : i64} {
  func.func @_mdn_kernel(%arg0: i32, %arg1: memref<8x32xf32, #tpu.memory_space<vmem>>, %arg2: memref<32x768xf32, #tpu.memory_space<vmem>>, %arg3: memref<1x768xf32, #tpu.memory_space<vmem>>, %arg4: memref<768x128xf32, #tpu.memory_space<vmem>>, %arg5: memref<1x128xf32, #tpu.memory_space<vmem>>, %arg6: memref<8x128xf32, #tpu.memory_space<vmem>>) attributes {dimension_semantics = [#tpu.dimension_semantics<parallel>], iteration_bounds = array<i64: 1>, scalar_prefetch = 0 : i64, scratch_operands = 0 : i64, tpu.core_type = #tpu.core_type<tc>, window_params = [{transform_indices = @transform_0, window_bounds = array<i64: 8, 32>}, {pipeline_mode = #tpu.pipeline_mode<synchronous>, transform_indices = @transform_1, window_bounds = array<i64: 32, 768>}, {pipeline_mode = #tpu.pipeline_mode<synchronous>, transform_indices = @transform_2, window_bounds = array<i64: 1, 768>}, {pipeline_mode = #tpu.pipeline_mode<synchronous>, transform_indices = @transform_3, window_bounds = array<i64: 768, 128>}, {pipeline_mode = #tpu.pipeline_mode<synchronous>, transform_indices = @transform_4, window_bounds = array<i64: 1, 128>}, {transform_indices = @transform_5, window_bounds = array<i64: 8, 128>}]} {
    %c0 = arith.constant 0 : index
    %c0_0 = arith.constant 0 : index
    %0 = vector.load %arg1[%c0, %c0_0] : memref<8x32xf32, #tpu.memory_space<vmem>>, vector<8x32xf32>
    %c0_1 = arith.constant 0 : index
    %c0_2 = arith.constant 0 : index
    %1 = vector.load %arg2[%c0_1, %c0_2] : memref<32x768xf32, #tpu.memory_space<vmem>>, vector<32x768xf32>
    %cst = arith.constant dense<0.000000e+00> : vector<8x768xf32>
    %2 = tpu.matmul %0, %1, %cst {dimension_numbers = #tpu.dot_dimension_numbers<[1], [0], [0], [1], [0, 0, 1, 1], [], []>} : vector<8x32xf32>, vector<32x768xf32>, vector<8x768xf32> -> vector<8x768xf32>
    %c0_3 = arith.constant 0 : index
    %c0_4 = arith.constant 0 : index
    %3 = vector.load %arg3[%c0_3, %c0_4] : memref<1x768xf32, #tpu.memory_space<vmem>>, vector<1x768xf32>
    %4 = vector.broadcast %3 : vector<1x768xf32> to vector<8x768xf32>
    %5 = arith.addf %2, %4 : vector<8x768xf32>
    %cst_5 = arith.constant 0.000000e+00 : f32
    %6 = vector.broadcast %cst_5 : f32 to vector<8x768xf32>
    %7 = arith.maximumf %5, %6 : vector<8x768xf32>
    %c0_6 = arith.constant 0 : index
    %c0_7 = arith.constant 0 : index
    %8 = vector.load %arg4[%c0_6, %c0_7] : memref<768x128xf32, #tpu.memory_space<vmem>>, vector<768x128xf32>
    %cst_8 = arith.constant dense<0.000000e+00> : vector<8x128xf32>
    %9 = tpu.matmul %7, %8, %cst_8 {dimension_numbers = #tpu.dot_dimension_numbers<[1], [0], [0], [1], [0, 0, 1, 1], [], []>} : vector<8x768xf32>, vector<768x128xf32>, vector<8x128xf32> -> vector<8x128xf32>
    %c0_9 = arith.constant 0 : index
    %c0_10 = arith.constant 0 : index
    %10 = vector.load %arg5[%c0_9, %c0_10] : memref<1x128xf32, #tpu.memory_space<vmem>>, vector<1x128xf32>
    %11 = vector.broadcast %10 : vector<1x128xf32> to vector<8x128xf32>
    %12 = arith.addf %9, %11 : vector<8x128xf32>
    %13 = tpu.iota {dimensions = array<i32: 1>} : vector<8x128xi32>
    %c8_i32 = arith.constant 8 : i32
    %14 = vector.broadcast %c8_i32 : i32 to vector<8x128xi32>
    %15 = arith.cmpi slt, %13, %14 : vector<8x128xi32>
    %cst_11 = arith.constant 1.000000e+00 : f32
    %16 = vector.broadcast %cst_11 : f32 to vector<8x128xf32>
    %17 = arith.mulf %12, %16 : vector<8x128xf32>
    %cst_12 = arith.constant 0xFF800000 : f32
    %18 = vector.broadcast %cst_12 : f32 to vector<8x128xf32>
    %19 = arith.select %15, %17, %18 : vector<8x128xi1>, vector<8x128xf32>
    %cst_13 = arith.constant dense<0xFF800000> : vector<8xf32>
    %20 = vector.multi_reduction <maximumf>, %19, %cst_13 [1] : vector<8x128xf32> to vector<8xf32>
    %21 = vector.shape_cast %20 : vector<8xf32> to vector<8x1xf32>
    %22 = vector.broadcast %21 : vector<8x1xf32> to vector<8x128xf32>
    %23 = arith.subf %19, %22 : vector<8x128xf32>
    %24 = math.exp %23 : vector<8x128xf32>
    %cst_14 = arith.constant dense<0.000000e+00> : vector<8xf32>
    %25 = vector.multi_reduction <add>, %24, %cst_14 [1] : vector<8x128xf32> to vector<8xf32>
    %26 = vector.shape_cast %25 : vector<8xf32> to vector<8x1xf32>
    %27 = tpu.reciprocal %26 {approx = true} : vector<8x1xf32> -> vector<8x1xf32>
    %28 = vector.broadcast %27 : vector<8x1xf32> to vector<8x128xf32>
    %29 = arith.mulf %24, %28 : vector<8x128xf32>
    %c40_i32 = arith.constant 40 : i32
    %30 = vector.broadcast %c40_i32 : i32 to vector<8x128xi32>
    %31 = arith.cmpi slt, %13, %30 : vector<8x128xi32>
    %cst_15 = arith.constant 2.000000e+01 : f32
    %cst_16 = arith.constant 5.000000e+00 : f32
    %32 = vector.broadcast %cst_15 : f32 to vector<8x128xf32>
    %33 = vector.broadcast %cst_16 : f32 to vector<8x128xf32>
    %34 = arith.select %31, %32, %33 : vector<8x128xi1>, vector<8x128xf32>
    %35 = arith.cmpf ogt, %12, %34 : vector<8x128xf32>
    %36 = arith.minimumf %12, %34 : vector<8x128xf32>
    %37 = math.exp %36 : vector<8x128xf32>
    %38 = math.log1p %37 : vector<8x128xf32>
    %39 = arith.select %35, %12, %38 : vector<8x128xi1>, vector<8x128xf32>
    %c72_i32 = arith.constant 72 : i32
    %40 = vector.broadcast %c72_i32 : i32 to vector<8x128xi32>
    %41 = arith.cmpi slt, %13, %40 : vector<8x128xi32>
    %cst_17 = arith.constant 0.000000e+00 : f32
    %42 = vector.broadcast %cst_17 : f32 to vector<8x128xf32>
    %43 = arith.select %41, %39, %42 : vector<8x128xi1>, vector<8x128xf32>
    %44 = arith.select %15, %29, %43 : vector<8x128xi1>, vector<8x128xf32>
    %c0_18 = arith.constant 0 : index
    %c0_19 = arith.constant 0 : index
    %45 = vector.load %arg6[%c0_18, %c0_19] : memref<8x128xf32, #tpu.memory_space<vmem>>, vector<8x128xf32>
    tpu.vector_store %arg6[%c0_18, %c0_19], %44 {strides = array<i32>} : memref<8x128xf32, #tpu.memory_space<vmem>>, vector<8x128xf32>,
    return
  }
  func.func @transform_0(%arg0: i32) -> (i32, i32) {
    %c0_i32 = arith.constant 0 : i32
    %c0_i32_0 = arith.constant 0 : i32
    return %arg0, %c0_i32 : i32, i32
  }
  func.func @transform_1(%arg0: i32) -> (i32, i32) {
    %c0_i32 = arith.constant 0 : i32
    %c0_i32_0 = arith.constant 0 : i32
    %c0_i32_1 = arith.constant 0 : i32
    return %c0_i32, %c0_i32_0 : i32, i32
  }
  func.func @transform_2(%arg0: i32) -> (i32, i32) {
    %c0_i32 = arith.constant 0 : i32
    %c0_i32_0 = arith.constant 0 : i32
    %c0_i32_1 = arith.constant 0 : i32
    return %c0_i32, %c0_i32_0 : i32, i32
  }
  func.func @transform_3(%arg0: i32) -> (i32, i32) {
    %c0_i32 = arith.constant 0 : i32
    %c0_i32_0 = arith.constant 0 : i32
    %c0_i32_1 = arith.constant 0 : i32
    return %c0_i32, %c0_i32_0 : i32, i32
  }
  func.func @transform_4(%arg0: i32) -> (i32, i32) {
    %c0_i32 = arith.constant 0 : i32
    %c0_i32_0 = arith.constant 0 : i32
    %c0_i32_1 = arith.constant 0 : i32
    return %c0_i32, %c0_i32_0 : i32, i32
  }
  func.func @transform_5(%arg0: i32) -> (i32, i32) {
    %c0_i32 = arith.constant 0 : i32
    %c0_i32_0 = arith.constant 0 : i32
    return %arg0, %c0_i32 : i32, i32
  }
}

</mosaic_0001>

<bundles_post_ra>
// kernel: mdn_forward.1
= control target key start
LH: loop header
LB: loop body
LE: loop exit
PB: predicated region body
PF: predicated region fallthrough
CT: control target
= control target key end

     0   :  { %v769_v3 = vmov 0.0   ;;  %vm77_vm0 = vcmask 261120   ;;  %s1202_s1 = inlined_call_operand.vmem [shape: f32[32,768], index: 1, kind: input, shape index: {}]   ;;  %s1203_s0 = inlined_call_operand.vmem [shape: f32[8,32], index: 0, kind: input, shape index: {}]   ;;  %s1204_s3 = inlined_call_operand.vmem [shape: f32[768,128], index: 3, kind: input, shape index: {}]   ;;  %s1205_s2 = inlined_call_operand.vmem [shape: f32[1,768], index: 2, kind: input, shape index: {}]   ;;  %s1206_s4 = inlined_call_operand.vmem [shape: f32[1,128], index: 4, kind: input, shape index: {}]   ;;  %s1207_s5 = inlined_call_operand.vmem [shape: f32[8,128], index: 5, kind: output, shape index: {}]  }
   0x1   :  { %v40_v0 = vld [vmem:[%s1202_s1 + $0x98] sm:$0xff]  ;;  %v39_v1 = vld [vmem:[%s1202_s1 + $0x90] sm:$0xff]  ;;  %v34_v2 = vld [vmem:[%s1202_s1 + $0x68] sm:$0xff]  ;;  %145 = vmatprep.mubr.f32.mxu0 %v769_v3 }
   0x2   :  { %105 = vmatprep.subr.mxu0 %v40_v0  ;;  %v33_v4 = vld [vmem:[%s1202_s1 + $0x60] sm:$0xff]  ;;  %v28_v5 = vld [vmem:[%s1202_s1 + $0x38] sm:$0xff]  ;;  %v27_v6 = vld [vmem:[%s1202_s1 + $0x30] sm:$0xff] }
   0x3   :  { %106 = vmatpush1.msra.mxu0 %v39_v1  ;;  %v22_v7 = vld [vmem:[%s1202_s1 + $0x8] sm:$0xff]  ;;  %v21_v8 = vld [vmem:[%s1202_s1] sm:$0xff]  ;;  %v36_v12 = vld [vmem:[%s1202_s1 + $0x78] sm:$0xff] }
   0x4   :  { %107 = vmatprep.subr.mxu0 %v34_v2  ;;  %v828_v9 = vld [vmem:[%s1203_s0] sm:$0xff]  ;;  %v42_v10 = vld [vmem:[%s1202_s1 + $0xa8] sm:$0xff]  ;;  %v331_v13 = vld [vmem:[%s1204_s3 + $0xf8] sm:$0xff] }
   0x5   :  { %108 = vmatpush1.msra.mxu0 %v33_v4  ;;  %v41_v11 = vld [vmem:[%s1202_s1 + $0xa0] sm:$0xff]  ;;  %v35_v14 = vld [vmem:[%s1202_s1 + $0x70] sm:$0xff]  ;;  %v315_v15 = vld [vmem:[%s1204_s3 + $0x78] sm:$0xff]  ;;  %654 = vmatprep.subr.mxu1 %v331_v13 }
   0x6   :  { %109 = vmatprep.subr.mxu0 %v28_v5  ;;  %v30_v16 = vld [vmem:[%s1202_s1 + $0x48] sm:$0xff]  ;;  %v330_v17 = vld [vmem:[%s1204_s3 + $0xf0] sm:$0xff]  ;;  %v29_v18 = vld [vmem:[%s1202_s1 + $0x40] sm:$0xff]  ;;  %655 = vmatpush3.msra.mxu1 %v315_v15 }
   0x7   :  { %110 = vmatpush1.msra.mxu0 %v27_v6  ;;  %v314_v19 = vld [vmem:[%s1204_s3 + $0x70] sm:$0xff]  ;;  %v24_v20 = vld [vmem:[%s1202_s1 + $0x18] sm:$0xff]  ;;  %v329_v21 = vld [vmem:[%s1204_s3 + $0xe8] sm:$0xff]  ;;  %656 = vmatprep.subr.mxu1 %v330_v17 }
   0x8   :  { %111 = vmatprep.subr.mxu0 %v22_v7  ;;  %v23_v22 = vld [vmem:[%s1202_s1 + $0x10] sm:$0xff]  ;;  %v313_v23 = vld [vmem:[%s1204_s3 + $0x68] sm:$0xff]  ;;  %v44_v24 = vld [vmem:[%s1202_s1 + $0xb8] sm:$0xff]  ;;  %657 = vmatpush3.msra.mxu1 %v314_v19 }
   0x9   :  { %112 = vmatpush1.msra.mxu0 %v21_v8  ;;  %v43_v25 = vld [vmem:[%s1202_s1 + $0xb0] sm:$0xff]  ;;  %658 = vmatprep.subr.mxu1 %v329_v21  ;;  %v38_v26 = vld [vmem:[%s1202_s1 + $0x88] sm:$0xff]  ;;  %v328_v27 = vld [vmem:[%s1204_s3 + $0xe0] sm:$0xff] }
   0xa   :  { %650 = vmatmul.mubr.msk.f32.vlgmr.msra.gmra.mxu0 %vm77_vm0, %v828_v9  ;;  %176 = vmatprep.subr.mxu0 %v42_v10  ;;  %v37_v28 = vld [vmem:[%s1202_s1 + $0x80] sm:$0xff]  ;;  %v32_v30 = vld [vmem:[%s1202_s1 + $0x58] sm:$0xff]  ;;  %v31_v32 = vld [vmem:[%s1202_s1 + $0x50] sm:$0xff] }
   0xb   :  { %177 = vmatpush1.msra.mxu0 %v41_v11  ;;  %216 = vmatprep.mubr.f32.mxu0 %v769_v3  ;;  %v312_v29 = vld [vmem:[%s1204_s3 + $0x60] sm:$0xff]  ;;  %v327_v31 = vld [vmem:[%s1204_s3 + $0xd8] sm:$0xff]  ;;  %v26_v34 = vld [vmem:[%s1202_s1 + $0x28] sm:$0xff] }
   0xc   :  { %178 = vmatprep.subr.mxu0 %v36_v12  ;;  %659 = vmatpush3.msra.mxu1 %v313_v23  ;;  %v311_v33 = vld [vmem:[%s1204_s3 + $0x58] sm:$0xff]  ;;  %v326_v35 = vld [vmem:[%s1204_s3 + $0xd0] sm:$0xff]  ;;  %v25_v36 = vld [vmem:[%s1202_s1 + $0x20] sm:$0xff] }
   0xd   :  { %179 = vmatpush1.msra.mxu0 %v35_v14  ;;  %660 = vmatprep.subr.mxu1 %v328_v27  ;;  %v310_v37 = vld [vmem:[%s1204_s3 + $0x50] sm:$0xff]  ;;  %v363_v38 = vld [vmem:[%s1204_s3 + $0x1f8] sm:$0xff]  ;;  %v325_v40 = vld [vmem:[%s1204_s3 + $0xc8] sm:$0xff]  ;;  %v47_v27 = vlaneseq }
   0xe   :  { %180 = vmatprep.subr.mxu0 %v30_v16  ;;  %661 = vmatpush3.msra.mxu1 %v312_v29  ;;  %v347_v39 = vld [vmem:[%s1204_s3 + $0x178] sm:$0xff]  ;;  %v362_v41 = vld [vmem:[%s1204_s3 + $0x1f0] sm:$0xff]  ;;  %v309_v42 = vld [vmem:[%s1204_s3 + $0x48] sm:$0xff] }
   0xf   :  { %181 = vmatpush1.msra.mxu0 %v29_v18  ;;  %662 = vmatprep.subr.mxu1 %v327_v31  ;;  %v346_v43 = vld [vmem:[%s1204_s3 + $0x170] sm:$0xff]  ;;  %v324_v44 = vld [vmem:[%s1204_s3 + $0xc0] sm:$0xff]  ;;  %v361_v45 = vld [vmem:[%s1204_s3 + $0x1e8] sm:$0xff] }
  0x10   :  { %182 = vmatprep.subr.mxu0 %v24_v20  ;;  %663 = vmatpush3.msra.mxu1 %v311_v33  ;;  %v308_v46 = vld [vmem:[%s1204_s3 + $0x40] sm:$0xff]  ;;  %v345_v47 = vld [vmem:[%s1204_s3 + $0x168] sm:$0xff]  ;;  %v323_v48 = vld [vmem:[%s1204_s3 + $0xb8] sm:$0xff] }
  0x11   :  { %183 = vmatpush1.msra.mxu0 %v23_v22  ;;  %664 = vmatprep.subr.mxu1 %v326_v35  ;;  %v360_v49 = vld [vmem:[%s1204_s3 + $0x1e0] sm:$0xff]  ;;  %v307_v50 = vld [vmem:[%s1204_s3 + $0x38] sm:$0xff]  ;;  %v322_v52 = vld [vmem:[%s1204_s3 + $0xb0] sm:$0xff] }
  0x12   :  { %651 = vmatmul.mubr.msk.f32.vlgmr.msra.gmra.mxu0 %vm77_vm0, %v828_v9  ;;  %247 = vmatprep.subr.mxu0 %v44_v24  ;;  %v344_v51 = vld [vmem:[%s1204_s3 + $0x160] sm:$0xff]  ;;  %v359_v53 = vld [vmem:[%s1204_s3 + $0x1d8] sm:$0xff]  ;;  %v306_v54 = vld [vmem:[%s1204_s3 + $0x30] sm:$0xff] }
  0x13   :  { %248 = vmatpush1.msra.mxu0 %v43_v25  ;;  %287 = vmatprep.mubr.f32.mxu0 %v769_v3  ;;  %v343_v55 = vld [vmem:[%s1204_s3 + $0x158] sm:$0xff]  ;;  %v321_v56 = vld [vmem:[%s1204_s3 + $0xa8] sm:$0xff]  ;;  %v358_v57 = vld [vmem:[%s1204_s3 + $0x1d0] sm:$0xff] }
  0x14   :  { %249 = vmatprep.subr.mxu0 %v38_v26  ;;  %665 = vmatpush3.msra.mxu1 %v310_v37  ;;  %v305_v58 = vld [vmem:[%s1204_s3 + $0x28] sm:$0xff]  ;;  %v342_v59 = vld [vmem:[%s1204_s3 + $0x150] sm:$0xff]  ;;  %v320_v60 = vld [vmem:[%s1204_s3 + $0xa0] sm:$0xff] }
  0x15   :  { %250 = vmatpush1.msra.mxu0 %v37_v28  ;;  %666 = vmatprep.subr.mxu1 %v325_v40  ;;  %v357_v61 = vld [vmem:[%s1204_s3 + $0x1c8] sm:$0xff]  ;;  %v304_v62 = vld [vmem:[%s1204_s3 + $0x20] sm:$0xff]  ;;  %v319_v0 = vld [vmem:[%s1204_s3 + $0x98] sm:$0xff]  ;;  %v1080_v28 = vshrl.u32 %v47_v27, 7 }
  0x16   :  { %251 = vmatprep.subr.mxu0 %v32_v30  ;;  %667 = vmatpush3.msra.mxu1 %v309_v42  ;;  %v341_v63 = vld [vmem:[%s1204_s3 + $0x148] sm:$0xff]  ;;  %v356_v1 = vld [vmem:[%s1204_s3 + $0x1c0] sm:$0xff]  ;;  %v303_v3 = vld [vmem:[%s1204_s3 + $0x18] sm:$0xff] }
  0x17   :  { %252 = vmatpush1.msra.mxu0 %v31_v32  ;;  %668 = vmatprep.subr.mxu1 %v324_v44  ;;  %v340_v2 = vld [vmem:[%s1204_s3 + $0x140] sm:$0xff]  ;;  %v355_v4 = vld [vmem:[%s1204_s3 + $0x1b8] sm:$0xff]  ;;  %v318_v5 = vld [vmem:[%s1204_s3 + $0x90] sm:$0xff]  ;;  %v49_v29 = vsub.s32 0, %v1080_v28  ;;  %v53_v31 = vsub.s32 1, %v1080_v28  ;;  %v57_v35 = vsub.s32 2, %v1080_v28 }
  0x18   :  { %253 = vmatprep.subr.mxu0 %v26_v34  ;;  %669 = vmatpush3.msra.mxu1 %v308_v46  ;;  %v339_v6 = vld [vmem:[%s1204_s3 + $0x138] sm:$0xff]  ;;  %v302_v7 = vld [vmem:[%s1204_s3 + $0x10] sm:$0xff]  ;;  %v301_v11 = vld [vmem:[%s1204_s3 + $0x8] sm:$0xff] }
  0x19   :  { %254 = vmatpush1.msra.mxu0 %v25_v36  ;;  %670 = vmatprep.subr.mxu1 %v323_v48  ;;  %v354_v8 = vld [vmem:[%s1204_s3 + $0x1b0] sm:$0xff]  ;;  %v353_v12 = vld [vmem:[%s1204_s3 + $0x1a8] sm:$0xff]  ;;  %v316_v13 = vld [vmem:[%s1204_s3 + $0x80] sm:$0xff] }
  0x1a   :  { %652 = vmatmul.mubr.msk.f32.vlgmr.msra.gmra.mxu0 %vm77_vm0, %v828_v9  ;;  %689 = vmatprep.subr.mxu0 %v363_v38  ;;  %v317_v9 = vld [vmem:[%s1204_s3 + $0x88] sm:$0xff]  ;;  %v338_v10 = vld [vmem:[%s1204_s3 + $0x130] sm:$0xff]  ;;  %v300_v15 = vld [vmem:[%s1204_s3] sm:$0xff] }
  0x1b   :  { %690 = vmatpush3.msra.mxu0 %v347_v39  ;;  %671 = vmatpush3.msra.mxu1 %v307_v50  ;;  %v337_v14 = vld [vmem:[%s1204_s3 + $0x128] sm:$0xff]  ;;  %v352_v16 = vld [vmem:[%s1204_s3 + $0x1a0] sm:$0xff]  ;;  %v395_v18 = vld [vmem:[%s1204_s3 + $0x2f8] sm:$0xff]  ;;  %v61_v39 = vsub.s32 3, %v1080_v28 }
  0x1c   :  { %691 = vmatprep.subr.mxu0 %v362_v41  ;;  %672 = vmatprep.subr.mxu1 %v322_v52  ;;  %v336_v17 = vld [vmem:[%s1204_s3 + $0x120] sm:$0xff]  ;;  %v351_v19 = vld [vmem:[%s1204_s3 + $0x198] sm:$0xff]  ;;  %v350_v21 = vld [vmem:[%s1204_s3 + $0x190] sm:$0xff] }
  0x1d   :  { %692 = vmatpush3.msra.mxu0 %v346_v43  ;;  %673 = vmatpush3.msra.mxu1 %v306_v54  ;;  %v335_v20 = vld [vmem:[%s1204_s3 + $0x118] sm:$0xff]  ;;  %v334_v22 = vld [vmem:[%s1204_s3 + $0x110] sm:$0xff]  ;;  %v349_v23 = vld [vmem:[%s1204_s3 + $0x188] sm:$0xff]  ;;  %v69_v54 = vsub.s32 5, %v1080_v28 }
  0x1e   :  { %693 = vmatprep.subr.mxu0 %v361_v45  ;;  %674 = vmatprep.subr.mxu1 %v321_v56  ;;  %v333_v24 = vld [vmem:[%s1204_s3 + $0x108] sm:$0xff]  ;;  %v348_v25 = vld [vmem:[%s1204_s3 + $0x180] sm:$0xff]  ;;  %v379_v43 = vld [vmem:[%s1204_s3 + $0x278] sm:$0xff] }
  0x1f   :  { %694 = vmatpush3.msra.mxu0 %v345_v47  ;;  %675 = vmatpush3.msra.mxu1 %v305_v58  ;;  %v332_v26 = vld [vmem:[%s1204_s3 + $0x100] sm:$0xff]  ;;  %v394_v44 = vld [vmem:[%s1204_s3 + $0x2f0] sm:$0xff]  ;;  %v391_v58 = vld [vmem:[%s1204_s3 + $0x2d8] sm:$0xff] }
  0x20   :  { %695 = vmatprep.subr.mxu0 %v360_v49  ;;  %676 = vmatprep.subr.mxu1 %v320_v60  ;;  %v1086_v30 = vld [vmem:[%s1205_s2] sm:$0x3f]  ;;  %v378_v47 = vld [vmem:[%s1204_s3 + $0x270] sm:$0xff]  ;;  %v393_v49 = vld [vmem:[%s1204_s3 + $0x2e8] sm:$0xff] }
  0x21   :  { %696 = vmatpush3.msra.mxu0 %v344_v51  ;;  %677 = vmatpush3.msra.mxu1 %v304_v62  ;;  %v50_v32 = vrot.slane %v1086_v30, %v49_v29  ;;  %v54_v33 = vrot.slane %v1086_v30, %v53_v31  ;;  %v58_v41 = vrot.slane %v1086_v30, %v57_v35  ;;  %v377_v51 = vld [vmem:[%s1204_s3 + $0x268] sm:$0xff]  ;;  %v376_v56 = vld [vmem:[%s1204_s3 + $0x260] sm:$0xff]  ;;  %v390_v60 = vld [vmem:[%s1204_s3 + $0x2d0] sm:$0xff] }
  0x22   :  { %697 = vmatprep.subr.mxu0 %v359_v53  ;;  %678 = vmatprep.subr.mxu1 %v319_v0  ;;  %v62_v45 = vrot.slane %v1086_v30, %v61_v39  ;;  %v392_v53 = vld [vmem:[%s1204_s3 + $0x2e0] sm:$0xff]  ;;  %v374_v62 = vld [vmem:[%s1204_s3 + $0x250] sm:$0xff]  ;;  %v389_v0 = vld [vmem:[%s1204_s3 + $0x2c8] sm:$0xff] }
  0x23   :  { %698 = vmatpush3.msra.mxu0 %v343_v55  ;;  %679 = vmatpush3.msra.mxu1 %v303_v3  ;;  %v388_v3 = vld [vmem:[%s1204_s3 + $0x2c0] sm:$0xff] }
  0x24   :  { %699 = vmatprep.subr.mxu0 %v358_v57  ;;  %680 = vmatprep.subr.mxu1 %v318_v5  ;;  %v372_v5 = vld [vmem:[%s1204_s3 + $0x240] sm:$0xff] }
  0x25   :  { %700 = vmatpush3.msra.mxu0 %v342_v59  ;;  %681 = vmatpush3.msra.mxu1 %v302_v7  ;;  %v375_v59 = vld [vmem:[%s1204_s3 + $0x258] sm:$0xff] }
  0x26   :  { %701 = vmatprep.subr.mxu0 %v357_v61  ;;  %682 = vmatprep.subr.mxu1 %v317_v9  ;;  %v70_v61 = vrot.slane %v1086_v30, %v69_v54  ;;  %v386_v9 = vld [vmem:[%s1204_s3 + $0x2b0] sm:$0xff] }
  0x27   :  { %702 = vmatpush3.msra.mxu0 %v341_v63  ;;  %683 = vmatpush3.msra.mxu1 %v301_v11  ;;  %v385_v11 = vld [vmem:[%s1204_s3 + $0x2a8] sm:$0xff] }
  0x28   :  { %703 = vmatprep.subr.mxu0 %v356_v1  ;;  %684 = vmatprep.subr.mxu1 %v316_v13  ;;  %v373_v1 = vld [vmem:[%s1204_s3 + $0x248] sm:$0xff]  ;;  %v65_v13 = vsub.s32 4, %v1080_v28 }
  0x29   :  { %704 = vmatpush3.msra.mxu0 %v340_v2  ;;  %685 = vmatpush3.msra.mxu1 %v300_v15  ;;  %v368_v15 = vld [vmem:[%s1204_s3 + $0x220] sm:$0xff] }
  0x2a   :  { %705 = vmatprep.subr.mxu0 %v355_v4  ;;  %724 = vmatprep.subr.mxu1 %v395_v18  ;;  %v367_v18 = vld [vmem:[%s1204_s3 + $0x218] sm:$0xff] }
  0x2b   :  { %706 = vmatpush3.msra.mxu0 %v339_v6  ;;  %v387_v6 = vld [vmem:[%s1204_s3 + $0x2b8] sm:$0xff] }
  0x2c   :  { %707 = vmatprep.subr.mxu0 %v354_v8  ;;  %v371_v8 = vld [vmem:[%s1204_s3 + $0x238] sm:$0xff] }
  0x2d   :  { %708 = vmatpush3.msra.mxu0 %v338_v10  ;;  %v370_v10 = vld [vmem:[%s1204_s3 + $0x230] sm:$0xff] }
  0x2e   :  { %709 = vmatprep.subr.mxu0 %v353_v12  ;;  %v369_v12 = vld [vmem:[%s1204_s3 + $0x228] sm:$0xff] }
  0x2f   :  { %710 = vmatpush3.msra.mxu0 %v337_v14  ;;  %v384_v14 = vld [vmem:[%s1204_s3 + $0x2a0] sm:$0xff] }
  0x30   :  { %711 = vmatprep.subr.mxu0 %v352_v16  ;;  %v383_v16 = vld [vmem:[%s1204_s3 + $0x298] sm:$0xff] }
  0x31   :  { %712 = vmatpush3.msra.mxu0 %v336_v17  ;;  %v66_v17 = vrot.slane %v1086_v30, %v65_v13 }
  0x32   :  { %713 = vmatprep.subr.mxu0 %v351_v19  ;;  %v382_v19 = vld [vmem:[%s1204_s3 + $0x290] sm:$0xff] }
  0x33   :  { %714 = vmatpush3.msra.mxu0 %v335_v20  ;;  %v366_v20 = vld [vmem:[%s1204_s3 + $0x210] sm:$0xff] }
  0x34   :  { %715 = vmatprep.subr.mxu0 %v350_v21  ;;  %v381_v21 = vld [vmem:[%s1204_s3 + $0x288] sm:$0xff] }
  0x35   :  { %716 = vmatpush3.msra.mxu0 %v334_v22 }
  0x36   :  { %717 = vmatprep.subr.mxu0 %v349_v23  ;;  %v365_v23 = vld [vmem:[%s1204_s3 + $0x208] sm:$0xff] }
  0x37   :  { %718 = vmatpush3.msra.mxu0 %v333_v24  ;;  %v380_v24 = vld [vmem:[%s1204_s3 + $0x280] sm:$0xff] }
  0x38   :  { %719 = vmatprep.subr.mxu0 %v348_v25  ;;  %v364_v25 = vld [vmem:[%s1204_s3 + $0x200] sm:$0xff] }
  0x39   :  { %720 = vmatpush3.msra.mxu0 %v332_v26 }
  0xca   :  { %v147_v34 = vpop.f32.mrf.mxu0 }
  0xcb   :  { %v148_v36 = vadd.f32 %v147_v34, %v50_v32  ;;  %v653_v34 = vld [vmem:[%s1206_s4] ss:$0 sm:$0xff] }
  0xcc   :  { %v149_v37 = vpop.f32.mrf.mxu0 }
  0xcd   :  { %v150_v38 = vadd.f32 %v149_v37, %v54_v33  ;;  %v294_v42 = vmax.f32 %v148_v36, 0.0  ;;  %v614_v33 = vand.u32 127, %v47_v27 }
  0xcf   :  { %v295_v40 = vmax.f32 %v150_v38, 0.0  ;;  %vm626_vm1 = vcmp.lt.s32.totalorder %v614_v33, 40  ;;  %vm615_vm2 = vcmp.lt.s32.totalorder %v614_v33, 8  ;;  %vm642_vm5 = vcmp.lt.s32.totalorder %v614_v33, 72 }
  0xd1   :  { %467 = vmatprep.mubr.f32.mxu1 %v295_v40 }
  0xd2   :  { %v218_v46 = vpop.f32.mrf.mxu0  ;;  %468 = vmatmul.mubr.f32.vlgmr.msra.gmra.mxu1 %v294_v42 }
  0xd3   :  { %v219_v48 = vadd.f32 %v218_v46, %v58_v41  ;;  %725 = vmatpush3.msra.mxu1 %v379_v43  ;;  %v770_v41 = vmov 5.0  }
  0xd4   :  { %726 = vmatprep.subr.mxu1 %v394_v44  ;;  %v220_v50 = vpop.f32.mrf.mxu0  ;;  %v627_v42 = vsel %vm626_vm1, 20.0, %v770_v41 }
  0xd5   :  { %v221_v52 = vadd.f32 %v220_v50, %v62_v45  ;;  %727 = vmatpush3.msra.mxu1 %v378_v47  ;;  %v296_v55 = vmax.f32 %v219_v48, 0.0 }
  0xd6   :  { %728 = vmatprep.subr.mxu1 %v393_v49 }
  0xd7   :  { %v297_v57 = vmax.f32 %v221_v52, 0.0  ;;  %729 = vmatpush3.msra.mxu1 %v377_v51 }
  0xd8   :  { %730 = vmatprep.subr.mxu1 %v392_v53 }
  0xd9   :  { %731 = vmatpush3.msra.mxu1 %v376_v56  ;;  %537 = vmatprep.mubr.f32.mxu0 %v297_v57 }
  0xda   :  { %732 = vmatprep.subr.mxu1 %v391_v58  ;;  %538 = vmatmul.mubr.f32.vlgmr.msra.gmra.mxu0 %v296_v55  ;;  %v289_v63 = vpop.f32.mrf.mxu0 }
  0xdb   :  { %733 = vmatpush3.msra.mxu1 %v375_v59  ;;  %v290_v22 = vadd.f32 %v289_v63, %v66_v17 }
  0xdc   :  { %734 = vmatprep.subr.mxu1 %v390_v60  ;;  %v291_v2 = vpop.f32.mrf.mxu0 }
  0xdd   :  { %735 = vmatpush3.msra.mxu1 %v374_v62  ;;  %v292_v4 = vadd.f32 %v291_v2, %v70_v61  ;;  %v298_v26 = vmax.f32 %v290_v22, 0.0 }
  0xde   :  { %736 = vmatprep.subr.mxu1 %v389_v0 }
  0xdf   :  { %737 = vmatpush3.msra.mxu1 %v373_v1  ;;  %v299_v7 = vmax.f32 %v292_v4, 0.0 }
  0xe0   :  { %738 = vmatprep.subr.mxu1 %v388_v3 }
  0xe1   :  { %739 = vmatpush3.msra.mxu1 %v372_v5  ;;  %607 = vmatprep.mubr.f32.mxu1 %v299_v7 }
  0xe2   :  { %740 = vmatprep.subr.mxu1 %v387_v6 }
  0xe3   :  { %741 = vmatpush3.msra.mxu1 %v371_v8 }
  0xe4   :  { %742 = vmatprep.subr.mxu1 %v386_v9 }
  0xe5   :  { %743 = vmatpush3.msra.mxu1 %v370_v10 }
  0xe6   :  { %744 = vmatprep.subr.mxu1 %v385_v11 }
  0xe7   :  { %745 = vmatpush3.msra.mxu1 %v369_v12 }
  0xe8   :  { %746 = vmatprep.subr.mxu1 %v384_v14 }
  0xe9   :  { %747 = vmatpush3.msra.mxu1 %v368_v15 }
  0xea   :  { %748 = vmatprep.subr.mxu1 %v383_v16 }
  0xeb   :  { %749 = vmatpush3.msra.mxu1 %v367_v18 }
  0xec   :  { %750 = vmatprep.subr.mxu1 %v382_v19 }
  0xed   :  { %751 = vmatpush3.msra.mxu1 %v366_v20 }
  0xee   :  { %752 = vmatprep.subr.mxu1 %v381_v21 }
  0xef   :  { %753 = vmatpush3.msra.mxu1 %v365_v23 }
  0xf0   :  { %754 = vmatprep.subr.mxu1 %v380_v24 }
  0xf1   :  { %755 = vmatpush3.msra.mxu1 %v364_v25 }
  0xf2   :  { %608 = vmatmul.mubr.f32.vlgmr.msra.gmra.mxu1 %v298_v26 }
 0x192   :  { %v686_v28 = vpop.f32.mrf.mxu1 }
 0x194   :  { %v687_v30 = vpop.f32.mrf.mxu1 }
 0x195   :  { %v688_v32 = vadd.f32 %v687_v30, %v686_v28 }
 0x197   :  { %v470_v37 = vadd.f32 %v688_v32, %v653_v34 }
 0x19a   :  { %v721_v29 = vpop.f32.mrf.mxu0 }
 0x19c   :  { %v722_v31 = vpop.f32.mrf.mxu0 }
 0x19d   :  { %v723_v35 = vadd.f32 %v722_v31, %v721_v29 }
 0x19f   :  { %v540_v39 = vadd.f32 %v723_v35, %v470_v37 }
 0x1b2   :  { %v756_v36 = vpop.f32.mrf.mxu1 }
 0x1b4   :  { %v757_v38 = vpop.f32.mrf.mxu1 }
 0x1b5   :  { %v758_v40 = vadd.f32 %v757_v38, %v756_v36 }
 0x1b7   :  { %v610_v43 = vadd.f32 %v758_v40, %v540_v39 }
 0x1b9   :  { %v616_v44 = vsel %vm615_vm2, %v610_v43, -inf  ;;  %vm628_vm3 = vcmp.gt.f32.partialorder %v610_v43, %v627_v42  ;;  %v629_v45 = vmin.f32 %v610_v43, %v627_v42 }
 0x1ba   :  { %617 = vmax.xlane.f32.xlu0 %v616_v44 }
 0x1bb   :  { %v630_v27 = vmul.f32 1.442695, %v629_v45 }
 0x1bd   :  { %761 = vpow2.f32 %v630_v27 }
 0x1ca   :  { %v762_v46 = vpop.eup %761 }
 0x1cb   :  { %v632_v47 = vadd.f32 1.0, %v762_v46  ;;  %v635_v48 = vmul.f32 -0.5, %v762_v46  ;;  %v638_v50 = vand.u32 2147483647, %v762_v46 }
 0x1cd   :  { %763 = vlog2.f32 %v632_v47  ;;  %v636_v49 = vadd.f32 1.0, %v635_v48  ;;  %vm639_vm4 = vcmp.lt.f32.partialorder %v638_v50, 0.0004427343 }
 0x1cf   :  { %v637_v53 = vmul.f32 %v762_v46, %v636_v49 }
 0x1da   :  { %v764_v51 = vpop.eup %763 }
 0x1db   :  { %v634_v52 = vmul.f32 0.6931472, %v764_v51 }
 0x1dd   :  { %v640_v54 = vsel %vm639_vm4, %v637_v53, %v634_v52 }
 0x1de   :  { %v641_v55 = vsel %vm628_vm3, %v610_v43, %v640_v54 }
 0x1df   :  { %v643_v56 = vsel %vm642_vm5, %v641_v55, 0.0 }
 0x243   :  { %v618_v57 = vpop.xlane.xlu0 %617 }
 0x244   :  { %v619_v58 = vsub.f32 %v616_v44, %v618_v57 }
 0x246   :  { %v620_v59 = vmul.f32 1.442695, %v619_v58 }
 0x248   :  { %765 = vpow2.f32 %v620_v59 }
 0x255   :  { %v766_v60 = vpop.eup %765 }
 0x256   :  { %622 = vadd.xlane.f32.xlu0 %v766_v60 }
 0x2df   :  { %v623_v61 = vpop.xlane.xlu0 %622 }
 0x2e0   :  { %767 = vrcp.f32 %v623_v61 }
 0x2ed   :  { %v768_v62 = vpop.eup %767 }
 0x2ee   :  { %v625_v63 = vmul.f32 %v768_v62, %v766_v60 }
 0x2f0   :  { %v644_v0 = vsel %vm615_vm2, %v625_v63, %v643_v56 }
 0x2f1   :  { %645 = vst [vmem:[%s1207_s5] sm:$0xff] %v644_v0 }

</bundles_post_ra>
